<compile_context>
chip_gen: v7x
topology: tpu7x:2x2x1
jax: 0.10.0
libtpu: 0.0.40
codegen_flags: <defaults>
</compile_context>

<pallas_src>
import functools
import math

import jax
import jax.numpy as jnp
from jax.experimental import pallas as pl
from jax.experimental.pallas import tpu as pltpu


_LANE = 128      # last-dim (lane) granule
_SUBLANE = 16    # 2nd-to-last granule (covers f32 (8) and bf16 (16) packing)


def _round_up(x, m):
    return (x + m - 1) // m * m


def _choose_tm(M, tm_max):
    """Row tile: large (amortize ~0.35us/grid-step), minimal last-tile padding,
    and >=2 grid steps when M is big enough so both v7x TensorCores get work."""
    M = max(int(M), 1)
    m_r = _round_up(M, _SUBLANE)
    if m_r <= tm_max:
        half = _round_up((M + 1) // 2, _SUBLANE)
        if half >= 4 * _SUBLANE:          # split for megacore only if halves stay healthy
            return half
        return m_r
    # Multiple tiles needed: among tiles in [tm_max/2, tm_max] pick the one
    # minimizing last-tile padding; largest tile wins ties.
    lo = max(_SUBLANE, (tm_max // 2) // _SUBLANE * _SUBLANE)
    best_tm, best_pad = tm_max, _round_up(M, tm_max) - M
    for cand in range(tm_max - _SUBLANE, lo - 1, -_SUBLANE):
        pad = _round_up(M, cand) - M
        if pad < best_pad:
            best_tm, best_pad = cand, pad
    return best_tm


def _fused_mlp_kernel(x_ref, *refs, num_layers, mxu_precision):
    """Fused MLP on one row tile.

    x_ref : (tm, D0_pad)                  activations (compute dtype)
    refs  : (w0, b0, w1, b1, ..., o_ref)  weights (Kl_pad, Nl_pad) compute dtype,
            biases (1, Nl_pad) f32, output (tm, Dlast_pad).
    """
    o_ref = refs[-1]
    wb = refs[:-1]

    h = x_ref[...]                                     # compute dtype
    for l in range(num_layers):                        # static unrolled loop
        w_ref = wb[2 * l]
        b_ref = wb[2 * l + 1]
        y = jnp.dot(h, w_ref[...],
                    preferred_element_type=jnp.float32,
                    precision=mxu_precision)
        y = y + b_ref[...]                             # f32 bias epilogue
        if l < num_layers - 1:
            h = jnp.maximum(y, 0.0).astype(x_ref.dtype)   # ReLU in f32, recast for MXU
        else:
            h = y
    o_ref[...] = h.astype(o_ref.dtype)


def prepare_mlp_params(params, compute_dtype=jnp.bfloat16):
    """Pad / cast weights & biases ONCE (hoisted out of the forward hot path).

    params: list of (w, b) with w stored as (in, out) so the kernel computes
    x @ W + b (matches nn.Linear's y = x W^T + b with W^T pre-materialized).
    """
    dims = [params[0][0].shape[0]] + [w.shape[1] for (w, _) in params]
    # Hidden/output dims lane-padded to 128 (lane-dense, unmasked stores);
    # the input dim keeps its true size (full-dim block is exempt), rounded
    # only to the sublane granule for friendly weight layout.
    pdims = [_round_up(dims[0], _SUBLANE)] + [_round_up(d, _LANE) for d in dims[1:]]

    flat_wb = []
    for l, (w, b) in enumerate(params):
        kp, np_ = pdims[l], pdims[l + 1]
        w_p = (jnp.zeros((kp, np_), compute_dtype)
               .at[:w.shape[0], :w.shape[1]].set(w.astype(compute_dtype)))
        b_p = (jnp.zeros((1, np_), jnp.float32)
               .at[0, :b.shape[0]].set(b.astype(jnp.float32)))
        flat_wb += [w_p, b_p]

    meta = dict(dims=tuple(int(d) for d in dims),
                pdims=tuple(int(d) for d in pdims),
                compute_dtype=jnp.dtype(compute_dtype))
    return tuple(flat_wb), meta


def mlp_forward_fused(x, flat_wb, meta, *, tm_max=512):
    """x: (..., input_dim) -> (..., output_dim). Matches PyTorch MLP.forward."""
    dims, pdims = meta["dims"], meta["pdims"]
    compute_dtype = meta["compute_dtype"]
    num_layers = len(dims) - 1
    in_dim, out_dim = dims[0], dims[-1]

    lead = x.shape[:-1]
    assert x.shape[-1] == in_dim
    x2 = x.reshape(-1, in_dim)
    M = x2.shape[0]
    out_dtype = x.dtype

    tm = _choose_tm(M, tm_max)
    M_pad = _round_up(M, tm)

    # zero-pad rows/lanes of the activation stream (padding contributes nothing)
    x_p = (jnp.zeros((M_pad, pdims[0]), compute_dtype)
           .at[:M, :in_dim].set(x2.astype(compute_dtype)))

    # ---- specs -------------------------------------------------------------
    in_specs = [pl.BlockSpec((tm, pdims[0]), lambda i: (i, 0))]          # x tile
    for l in range(num_layers):
        kp, np_ = pdims[l], pdims[l + 1]
        in_specs.append(pl.BlockSpec((kp, np_), lambda i: (0, 0),
                                     pipeline_mode=pl.Buffered(1)))      # resident weight
        in_specs.append(pl.BlockSpec((1, np_), lambda i: (0, 0),
                                     pipeline_mode=pl.Buffered(1)))      # resident bias
    out_specs = pl.BlockSpec((tm, pdims[-1]), lambda i: (i, 0))

    # ---- VMEM budget: single-buffered weights + double-buffered act tiles ---
    cd = jnp.dtype(compute_dtype).itemsize
    od = jnp.dtype(out_dtype).itemsize
    w_bytes = sum(int(a.size) * a.dtype.itemsize for a in flat_wb)
    act_bytes = 2 * tm * pdims[0] * cd + 2 * tm * pdims[-1] * od
    scratch_bytes = 2 * tm * max(pdims[1:]) * 4      # f32 intermediates / spill slack
    need = w_bytes + act_bytes + scratch_bytes
    vmem_limit = int(min(max(need + (4 << 20), 32 << 20), 56 << 20))
    # TODO(synk): on v5e/v6e (128 MiB VMEM) the 56 MiB cap could be raised for very
    # large MLPs; truly huge weights would instead need K/N tiling of each layer.

    flops = 2 * M_pad * sum(pdims[l] * pdims[l + 1] for l in range(num_layers))
    bytes_accessed = int(x_p.size) * cd + w_bytes + M_pad * pdims[-1] * od

    mxu_precision = (jax.lax.Precision.HIGHEST
                     if jnp.dtype(compute_dtype) == jnp.dtype(jnp.float32) else None)
    kernel = functools.partial(_fused_mlp_kernel, num_layers=num_layers,
                               mxu_precision=mxu_precision)

    out_p = pl.pallas_call(
        kernel,
        out_shape=jax.ShapeDtypeStruct((M_pad, pdims[-1]), out_dtype),
        grid_spec=pltpu.PrefetchScalarGridSpec(
            num_scalar_prefetch=0,
            grid=(M_pad // tm,),
            in_specs=in_specs,
            out_specs=out_specs,
        ),
        compiler_params=pltpu.CompilerParams(
            dimension_semantics=("parallel",),        # grid sharded across TCs on v7x
            vmem_limit_bytes=vmem_limit,
        ),
        cost_estimate=pl.CostEstimate(flops=int(flops), transcendentals=0,
                                      bytes_accessed=int(bytes_accessed)),
    )(x_p, *flat_wb)

    return out_p[:M, :out_dim].reshape(*lead, out_dim)


def init_mlp_params(key, input_dim, hidden_dim, output_dim, num_layers,
                    dtype=jnp.float32):
    """Deterministic init mirroring nn.Linear defaults (Kaiming-uniform-ish)."""
    h = [hidden_dim] * (num_layers - 1)
    dims_in = [input_dim] + h
    dims_out = h + [output_dim]
    params = []
    for n_in, n_out in zip(dims_in, dims_out):
        key, kw, kb = jax.random.split(key, 3)
        bound = 1.0 / math.sqrt(n_in)
        # stored as (in, out) so the kernel computes x @ W
        w = jax.random.uniform(kw, (n_in, n_out), dtype, -bound, bound)
        b = jax.random.uniform(kb, (n_out,), dtype, -bound, bound)
        params.append((w, b))
    return params


if __name__ == "__main__":
    key = jax.random.PRNGKey(0)

    # small shapes consistent with the module's forward: (batch, seq, input_dim)
    batch, seq = 2, 8
    input_dim, hidden_dim, output_dim, num_layers = 32, 64, 16, 3

    kx, kp = jax.random.split(key)
    x = jax.random.normal(kx, (batch, seq, input_dim), jnp.float32)
    params = init_mlp_params(kp, input_dim, hidden_dim, output_dim, num_layers)

    # plain-JAX fp32 reference (HIGHEST so the TPU reference matmul is true f32)
    ref = x.reshape(-1, input_dim)
    for i, (w, b) in enumerate(params):
        ref = jnp.dot(ref, w, precision=jax.lax.Precision.HIGHEST) + b
        if i < num_layers - 1:
            ref = jnp.maximum(ref, 0.0)
    ref = ref.reshape(batch, seq, output_dim)

    # 1) default: bf16 MXU operands + f32 accumulation (recommended on all gens)
    wb_bf16, meta_bf16 = prepare_mlp_params(params, compute_dtype=jnp.bfloat16)
    out_bf16 = jax.block_until_ready(mlp_forward_fused(x, wb_bf16, meta_bf16))
    assert out_bf16.shape == (batch, seq, output_dim)
    assert jnp.allclose(out_bf16, ref, atol=5e-2, rtol=5e-2)

    # 2) exact-fp32 path (HIGHEST matmul precision), matches the PyTorch fp32 forward
    wb_f32, meta_f32 = prepare_mlp_params(params, compute_dtype=jnp.float32)
    out_f32 = jax.block_until_ready(mlp_forward_fused(x, wb_f32, meta_f32))
    assert out_f32.shape == (batch, seq, output_dim)
    assert jnp.allclose(out_f32, ref, atol=1e-4, rtol=1e-4)

    print("KERNEL_OK")
</pallas_src>

<mosaic_0001>
module attributes {stable_mosaic.version = 11 : i64} {
  func.func @_fused_mlp_kernel(%arg0: i32, %arg1: memref<16x32xbf16, #tpu.memory_space<vmem>>, %arg2: memref<32x128xbf16, #tpu.memory_space<vmem>>, %arg3: memref<1x128xf32, #tpu.memory_space<vmem>>, %arg4: memref<128x128xbf16, #tpu.memory_space<vmem>>, %arg5: memref<1x128xf32, #tpu.memory_space<vmem>>, %arg6: memref<128x128xbf16, #tpu.memory_space<vmem>>, %arg7: memref<1x128xf32, #tpu.memory_space<vmem>>, %arg8: memref<16x128xf32, #tpu.memory_space<vmem>>) attributes {dimension_semantics = [#tpu.dimension_semantics<parallel>], iteration_bounds = array<i64: 1>, scalar_prefetch = 0 : i64, scratch_operands = 0 : i64, tpu.core_type = #tpu.core_type<tc>, window_params = [{transform_indices = @transform_0, window_bounds = array<i64: 16, 32>}, {pipeline_mode = #tpu.pipeline_mode<synchronous>, transform_indices = @transform_1, window_bounds = array<i64: 32, 128>}, {pipeline_mode = #tpu.pipeline_mode<synchronous>, transform_indices = @transform_2, window_bounds = array<i64: 1, 128>}, {pipeline_mode = #tpu.pipeline_mode<synchronous>, transform_indices = @transform_3, window_bounds = array<i64: 128, 128>}, {pipeline_mode = #tpu.pipeline_mode<synchronous>, transform_indices = @transform_4, window_bounds = array<i64: 1, 128>}, {pipeline_mode = #tpu.pipeline_mode<synchronous>, transform_indices = @transform_5, window_bounds = array<i64: 128, 128>}, {pipeline_mode = #tpu.pipeline_mode<synchronous>, transform_indices = @transform_6, window_bounds = array<i64: 1, 128>}, {transform_indices = @transform_7, window_bounds = array<i64: 16, 128>}]} {
    %c0 = arith.constant 0 : index
    %c0_0 = arith.constant 0 : index
    %0 = vector.load %arg1[%c0, %c0_0] : memref<16x32xbf16, #tpu.memory_space<vmem>>, vector<16x32xbf16>
    %c0_1 = arith.constant 0 : index
    %c0_2 = arith.constant 0 : index
    %1 = vector.load %arg2[%c0_1, %c0_2] : memref<32x128xbf16, #tpu.memory_space<vmem>>, vector<32x128xbf16>
    %cst = arith.constant dense<0.000000e+00> : vector<16x128xf32>
    %2 = tpu.matmul %0, %1, %cst {dimension_numbers = #tpu.dot_dimension_numbers<[1], [0], [0], [1], [0, 0, 1, 1], [], []>} : vector<16x32xbf16>, vector<32x128xbf16>, vector<16x128xf32> -> vector<16x128xf32>
    %c0_3 = arith.constant 0 : index
    %c0_4 = arith.constant 0 : index
    %3 = vector.load %arg3[%c0_3, %c0_4] : memref<1x128xf32, #tpu.memory_space<vmem>>, vector<1x128xf32>
    %4 = vector.broadcast %3 : vector<1x128xf32> to vector<16x128xf32>
    %5 = arith.addf %2, %4 : vector<16x128xf32>
    %cst_5 = arith.constant 0.000000e+00 : f32
    %6 = vector.broadcast %cst_5 : f32 to vector<16x128xf32>
    %7 = arith.maximumf %5, %6 : vector<16x128xf32>
    %8 = arith.truncf %7 : vector<16x128xf32> to vector<16x128xbf16>
    %c0_6 = arith.constant 0 : index
    %c0_7 = arith.constant 0 : index
    %9 = vector.load %arg4[%c0_6, %c0_7] : memref<128x128xbf16, #tpu.memory_space<vmem>>, vector<128x128xbf16>
    %cst_8 = arith.constant dense<0.000000e+00> : vector<16x128xf32>
    %10 = tpu.matmul %8, %9, %cst_8 {dimension_numbers = #tpu.dot_dimension_numbers<[1], [0], [0], [1], [0, 0, 1, 1], [], []>} : vector<16x128xbf16>, vector<128x128xbf16>, vector<16x128xf32> -> vector<16x128xf32>
    %c0_9 = arith.constant 0 : index
    %c0_10 = arith.constant 0 : index
    %11 = vector.load %arg5[%c0_9, %c0_10] : memref<1x128xf32, #tpu.memory_space<vmem>>, vector<1x128xf32>
    %12 = vector.broadcast %11 : vector<1x128xf32> to vector<16x128xf32>
    %13 = arith.addf %10, %12 : vector<16x128xf32>
    %cst_11 = arith.constant 0.000000e+00 : f32
    %14 = vector.broadcast %cst_11 : f32 to vector<16x128xf32>
    %15 = arith.maximumf %13, %14 : vector<16x128xf32>
    %16 = arith.truncf %15 : vector<16x128xf32> to vector<16x128xbf16>
    %c0_12 = arith.constant 0 : index
    %c0_13 = arith.constant 0 : index
    %17 = vector.load %arg6[%c0_12, %c0_13] : memref<128x128xbf16, #tpu.memory_space<vmem>>, vector<128x128xbf16>
    %cst_14 = arith.constant dense<0.000000e+00> : vector<16x128xf32>
    %18 = tpu.matmul %16, %17, %cst_14 {dimension_numbers = #tpu.dot_dimension_numbers<[1], [0], [0], [1], [0, 0, 1, 1], [], []>} : vector<16x128xbf16>, vector<128x128xbf16>, vector<16x128xf32> -> vector<16x128xf32>
    %c0_15 = arith.constant 0 : index
    %c0_16 = arith.constant 0 : index
    %19 = vector.load %arg7[%c0_15, %c0_16] : memref<1x128xf32, #tpu.memory_space<vmem>>, vector<1x128xf32>
    %20 = vector.broadcast %19 : vector<1x128xf32> to vector<16x128xf32>
    %21 = arith.addf %18, %20 : vector<16x128xf32>
    %c0_17 = arith.constant 0 : index
    %c0_18 = arith.constant 0 : index
    %22 = vector.load %arg8[%c0_17, %c0_18] : memref<16x128xf32, #tpu.memory_space<vmem>>, vector<16x128xf32>
    tpu.vector_store %arg8[%c0_17, %c0_18], %21 {strides = array<i32>} : memref<16x128xf32, #tpu.memory_space<vmem>>, vector<16x128xf32>,
    return
  }
  func.func @transform_0(%arg0: i32) -> (i32, i32) {
    %c0_i32 = arith.constant 0 : i32
    %c0_i32_0 = arith.constant 0 : i32
    return %arg0, %c0_i32 : i32, i32
  }
  func.func @transform_1(%arg0: i32) -> (i32, i32) {
    %c0_i32 = arith.constant 0 : i32
    %c0_i32_0 = arith.constant 0 : i32
    %c0_i32_1 = arith.constant 0 : i32
    return %c0_i32, %c0_i32_0 : i32, i32
  }
  func.func @transform_2(%arg0: i32) -> (i32, i32) {
    %c0_i32 = arith.constant 0 : i32
    %c0_i32_0 = arith.constant 0 : i32
    %c0_i32_1 = arith.constant 0 : i32
    return %c0_i32, %c0_i32_0 : i32, i32
  }
  func.func @transform_3(%arg0: i32) -> (i32, i32) {
    %c0_i32 = arith.constant 0 : i32
    %c0_i32_0 = arith.constant 0 : i32
    %c0_i32_1 = arith.constant 0 : i32
    return %c0_i32, %c0_i32_0 : i32, i32
  }
  func.func @transform_4(%arg0: i32) -> (i32, i32) {
    %c0_i32 = arith.constant 0 : i32
    %c0_i32_0 = arith.constant 0 : i32
    %c0_i32_1 = arith.constant 0 : i32
    return %c0_i32, %c0_i32_0 : i32, i32
  }
  func.func @transform_5(%arg0: i32) -> (i32, i32) {
    %c0_i32 = arith.constant 0 : i32
    %c0_i32_0 = arith.constant 0 : i32
    %c0_i32_1 = arith.constant 0 : i32
    return %c0_i32, %c0_i32_0 : i32, i32
  }
  func.func @transform_6(%arg0: i32) -> (i32, i32) {
    %c0_i32 = arith.constant 0 : i32
    %c0_i32_0 = arith.constant 0 : i32
    %c0_i32_1 = arith.constant 0 : i32
    return %c0_i32, %c0_i32_0 : i32, i32
  }
  func.func @transform_7(%arg0: i32) -> (i32, i32) {
    %c0_i32 = arith.constant 0 : i32
    %c0_i32_0 = arith.constant 0 : i32
    return %arg0, %c0_i32 : i32, i32
  }
}

</mosaic_0001>

<bundles_post_ra>
// kernel: tpu_custom_call.1
= control target key start
LH: loop header
LB: loop body
LE: loop exit
PB: predicated region body
PF: predicated region fallthrough
CT: control target
= control target key end

     0   :  { %12 = vsyncpa [#allocation3], 0  ;;  %s819_s0 = inlined_call_operand.hbm [shape: bf16[16,32], index: 0, kind: input, shape index: {}]   ;;  %s820_s1 = inlined_call_operand.hbm [shape: bf16[32,128], index: 1, kind: input, shape index: {}]   ;;  %s821_s2 = inlined_call_operand.vmem [shape: f32[1,128], index: 2, kind: input, shape index: {}]   ;;  %s822_s3 = inlined_call_operand.hbm [shape: bf16[128,128], index: 3, kind: input, shape index: {}]   ;;  %s823_s4 = inlined_call_operand.vmem [shape: f32[1,128], index: 4, kind: input, shape index: {}]   ;;  %s824_s5 = inlined_call_operand.hbm [shape: bf16[128,128], index: 5, kind: input, shape index: {}]   ;;  %s825_s6 = inlined_call_operand.vmem [shape: f32[1,128], index: 6, kind: input, shape index: {}]   ;;  %s826_s7 = inlined_call_operand.hbm [shape: f32[16,128], index: 7, kind: output, shape index: {}]  }
   0x1   :  { %13 = vsyncpa [#allocation6], 0 }
   0x2   :  { %14 = vsyncpa [#allocation9], 0 }
   0x3   :  { %15 = vsyncpa [#allocation4], 0  ;;  %s649_s24 = smov [#allocation5]   ;;  %s650_s26 = smov [#allocation2]  }
   0x4   :  { %s33_s25 = sshll.u32 %s649_s24, 4  ;;  %s21_s27 = sshll.u32 %s650_s26, 4  ;;  %s34_s25 = int_to_ptr.vmem [resolvable:$true] %s33_s25  ;;  %s700_s27 = int_to_ptr.vmem [resolvable:$true] %s21_s27 }
   0x5   :  { %s531_s30 = scalar_lea.hbm %s820_s1, 256 }
   0x6   :  { %p532_p0 = scmp.ne.s32.totalorder %s820_s1, %s531_s30  ;;  %p535_p1 = scmp.lt.u32.totalorder %s531_s30, %s820_s1 }
   0x8   :  { %p537_p2 = pnand %p535_p1, %p532_p0 }
   0xa   :  { %540 = shalt.err (!%p537_p2)
}
   0xb   :  { %s541_s12 = scalar_lea.vmem %s34_s25, 256  ;;  %p546_p4 = scmp.lt.s32.totalorder %s34_s25, %s34_s25 }
   0xc   :  { %p542_p3 = scmp.ne.s32.totalorder %s34_s25, %s541_s12  ;;  %p547_p5 = scmp.lt.s32.totalorder %s541_s12, %s541_s12 }
   0xe   :  { %p548_p6 = por %p547_p5, %p546_p4 }
  0x10   :  { %p549_p7 = pnand %p548_p6, %p542_p3 }
  0x12   :  { %552 = shalt.err (!%p549_p7)
}
  0x13   :  { %s651_s13 = smov 64   ;;  %s652_s14 = smov 4  }
  0x14   :  { %39 = dma.hbm_to_vmem [thread:$0]  %s820_s1, 256, %s34_s25, [#allocation6], %s651_s13, %s651_s13, %s652_s14  }
  0x15   :  { %s553_s19 = scalar_lea.hbm %s819_s0, 128 }
  0x16   :  { %p554_p8 = scmp.ne.s32.totalorder %s819_s0, %s553_s19  ;;  %p557_p9 = scmp.lt.u32.totalorder %s553_s19, %s819_s0 }
  0x18   :  { %p559_p10 = pnand %p557_p9, %p554_p8 }
  0x1a   :  { %562 = shalt.err (!%p559_p10)
}
  0x1b   :  { %s563_s24 = scalar_lea.vmem %s700_s27, 128  ;;  %p568_p12 = scmp.lt.s32.totalorder %s700_s27, %s700_s27 }
  0x1c   :  { %p564_p11 = scmp.ne.s32.totalorder %s700_s27, %s563_s24  ;;  %p569_p13 = scmp.lt.s32.totalorder %s563_s24, %s563_s24 }
  0x1e   :  { %p570_p0 = por %p569_p13, %p568_p12 }
  0x20   :  { %p571_p1 = pnand %p570_p0, %p564_p11 }
  0x22   :  { %574 = shalt.err (!%p571_p1)
}
  0x23   :  { %27 = dma.hbm_to_vmem [thread:$0]  %s819_s0, 128, %s700_s27, [#allocation3], %s651_s13, %s651_s13, %s652_s14  }
  0x24   :  { %s653_s26 = smov [#allocation7]   ;;  %s654_s29 = smov [#allocation8]  }
  0x25   :  { %s47_s28 = sshll.u32 %s653_s26, 4  ;;  %s61_s30 = sshll.u32 %s654_s29, 4  ;;  %s48_s28 = int_to_ptr.vmem [resolvable:$true] %s47_s28  ;;  %s737_s30 = int_to_ptr.vmem [resolvable:$true] %s61_s30 }
  0x26   :  { %s575_s10 = scalar_lea.hbm %s822_s3, 1024 }
  0x27   :  { %p576_p2 = scmp.ne.s32.totalorder %s822_s3, %s575_s10  ;;  %p579_p3 = scmp.lt.u32.totalorder %s575_s10, %s822_s3 }
  0x29   :  { %p581_p4 = pnand %p579_p3, %p576_p2 }
  0x2b   :  { %584 = shalt.err (!%p581_p4)
}
  0x2c   :  { %s585_s0 = scalar_lea.vmem %s48_s28, 1024  ;;  %p590_p6 = scmp.lt.s32.totalorder %s48_s28, %s48_s28 }
  0x2d   :  { %p586_p5 = scmp.ne.s32.totalorder %s48_s28, %s585_s0  ;;  %p591_p7 = scmp.lt.s32.totalorder %s585_s0, %s585_s0 }
  0x2f   :  { %p592_p8 = por %p591_p7, %p590_p6 }
  0x31   :  { %p593_p9 = pnand %p592_p8, %p586_p5 }
  0x33   :  { %596 = shalt.err (!%p593_p9)
}
  0x34   :  { %53 = dma.hbm_to_vmem [thread:$0]  %s822_s3, 1024, %s48_s28, [#allocation6], %s651_s13, %s651_s13, %s652_s14  }
  0x35   :  { %s597_s20 = scalar_lea.hbm %s824_s5, 1024 }
  0x36   :  { %p598_p10 = scmp.ne.s32.totalorder %s824_s5, %s597_s20  ;;  %p601_p11 = scmp.lt.u32.totalorder %s597_s20, %s824_s5 }
  0x38   :  { %p603_p12 = pnand %p601_p11, %p598_p10 }
  0x3a   :  { %606 = shalt.err (!%p603_p12)
}
  0x3b   :  { %s607_s1 = scalar_lea.vmem %s737_s30, 1024  ;;  %p612_p0 = scmp.lt.s32.totalorder %s737_s30, %s737_s30 }
  0x3c   :  { %p608_p13 = scmp.ne.s32.totalorder %s737_s30, %s607_s1  ;;  %p613_p1 = scmp.lt.s32.totalorder %s607_s1, %s607_s1 }
  0x3e   :  { %p614_p2 = por %p613_p1, %p612_p0 }
  0x40   :  { %p615_p3 = pnand %p614_p2, %p608_p13 }
  0x42   :  { %618 = shalt.err (!%p615_p3)
}
  0x43   :  { %67 = dma.hbm_to_vmem [thread:$0]  %s824_s5, 1024, %s737_s30, [#allocation9], %s651_s13, %s651_s13, %s652_s14  }
  0x44   :  { %641 = dma.done.wait [#allocation3], 128  }
  0x45   :  { %642 = vsyncadd [#allocation3], 4294967168 }
  0x46   :  { %643 = dma.done.wait [#allocation6], 1280  }
  0x47   :  { %644 = vsyncadd [#allocation6], 4294966016 }
  0x48   :  { %645 = dma.done.wait [#allocation9], 1024  }
  0x49   :  { %646 = vsyncadd [#allocation9], 4294966272  ;;  %v655_v0 = vmov 0.0   ;;  %vm656_vm0 = vmmov 0   ;;  %v512_v1 = vld [vmem:[#allocation5] sm:$0xff]   ;;  %v513_v2 = vld [vmem:[#allocation5 + $0x8] sm:$0xff]  }
  0x4a   :  { %453 = vmatprep.subr.bf16.mxu0 %v655_v0  ;;  %457 = vmatprep.mubr.msk.bf16.mxu0 %vm656_vm0, %v655_v0  ;;  %v515_v3 = vld [vmem:[#allocation7] sm:$0xff]   ;;  %v514_v4 = vld [vmem:[#allocation2] sm:$0xff]   ;;  %vm113_vm1 = vcmask 261120   ;;  %v517_v6 = vld [vmem:[#allocation7 + $0x10] sm:$0xff]   ;;  %s657_s29 = smov [#allocation10]  }
  0x4b   :  { %461 = vmatprep.subr.bf16.mxu1 %v655_v0  ;;  %477 = vmatprep.mubr.msk.bf16.mxu1 %vm656_vm0, %v655_v0  ;;  %v516_v5 = vld [vmem:[#allocation7 + $0x8] sm:$0xff]   ;;  %v518_v7 = vld [vmem:[#allocation7 + $0x18] sm:$0xff]   ;;  %v519_v8 = vld [vmem:[#allocation7 + $0x20] sm:$0xff]   ;;  %s395_s30 = sshll.u32 %s657_s29, 4  ;;  %s396_s30 = int_to_ptr.vmem [resolvable:$true] %s395_s30 }
  0x4c   :  { %454 = vmatpush3.bf16.msra.mxu0 %v512_v1  ;;  %462 = vmatpush3.bf16.msra.mxu1 %v515_v3  ;;  %v520_v9 = vld [vmem:[#allocation7 + $0x28] sm:$0xff]   ;;  %v521_v10 = vld [vmem:[#allocation7 + $0x30] sm:$0xff]   ;;  %v522_v11 = vld [vmem:[#allocation7 + $0x38] sm:$0xff]   ;;  %p624_p5 = scmp.lt.s32.totalorder %s396_s30, %s396_s30 }
  0x4d   :  { %455 = vmatprep.subr.bf16.mxu0 %v655_v0  ;;  %463 = vmatprep.subr.bf16.mxu1 %v655_v0  ;;  %v523_v12 = vld [vmem:[#allocation8] sm:$0xff]   ;;  %v524_v13 = vld [vmem:[#allocation8 + $0x8] sm:$0xff]   ;;  %v525_v14 = vld [vmem:[#allocation8 + $0x10] sm:$0xff]  }
  0x4e   :  { %v526_v15 = vld [vmem:[#allocation8 + $0x18] sm:$0xff]   ;;  %v527_v16 = vld [vmem:[#allocation8 + $0x20] sm:$0xff]   ;;  %v528_v17 = vld [vmem:[#allocation8 + $0x28] sm:$0xff]  }
  0x4f   :  { %v409_v18 = vld [vmem:[%s821_s2] ss:$0 sm:$0xff]  ;;  %v529_v28 = vld [vmem:[#allocation8 + $0x30] sm:$0xff]   ;;  %v530_v29 = vld [vmem:[#allocation8 + $0x38] sm:$0xff]  }
  0x50   :  { %456 = vmatpush3.bf16.msra.mxu0 %v513_v2  ;;  %464 = vmatpush3.bf16.msra.mxu1 %v516_v5  ;;  %v414_v30 = vld [vmem:[%s823_s4] ss:$0 sm:$0xff]  ;;  %s619_s4 = scalar_lea.vmem %s396_s30, 256 }
  0x51   :  { %481 = vmatprep.subr.bf16.mxu0 %v655_v0  ;;  %465 = vmatprep.subr.bf16.mxu1 %v655_v0  ;;  %v423_v40 = vld [vmem:[%s825_s6] ss:$0 sm:$0xff]  ;;  %p620_p4 = scmp.ne.s32.totalorder %s396_s30, %s619_s4  ;;  %p625_p6 = scmp.lt.s32.totalorder %s619_s4, %s619_s4 }
  0x53   :  { %458 = vmatmul.mubr.msk.bf16.vlgmr.msra.gmra.mrb[0].mxu0 %vm113_vm1, %v514_v4  ;;  %p626_p7 = por %p625_p6, %p624_p5 }
  0x54   :  { %497 = vmatprep.mubr.msk.bf16.mxu0 %vm656_vm0, %v655_v0  ;;  %466 = vmatpush3.bf16.msra.mxu1 %v517_v6 }
  0x55   :  { %467 = vmatprep.subr.bf16.mxu1 %v655_v0  ;;  %482 = vmatpush3.bf16.msra.mxu0 %v523_v12  ;;  %p627_p8 = pnand %p626_p7, %p620_p4 }
  0x56   :  { %483 = vmatprep.subr.bf16.mxu0 %v655_v0 }
  0x58   :  { %468 = vmatpush3.bf16.msra.mxu1 %v518_v7 }
  0x59   :  { %469 = vmatprep.subr.bf16.mxu1 %v655_v0  ;;  %484 = vmatpush3.bf16.msra.mxu0 %v524_v13 }
  0x5a   :  { %485 = vmatprep.subr.bf16.mxu0 %v655_v0 }
  0x5c   :  { %470 = vmatpush3.bf16.msra.mxu1 %v519_v8 }
  0x5d   :  { %471 = vmatprep.subr.bf16.mxu1 %v655_v0  ;;  %486 = vmatpush3.bf16.msra.mxu0 %v525_v14 }
  0x5e   :  { %487 = vmatprep.subr.bf16.mxu0 %v655_v0 }
  0x60   :  { %472 = vmatpush3.bf16.msra.mxu1 %v520_v9 }
  0x61   :  { %473 = vmatprep.subr.bf16.mxu1 %v655_v0  ;;  %488 = vmatpush3.bf16.msra.mxu0 %v526_v15 }
  0x62   :  { %489 = vmatprep.subr.bf16.mxu0 %v655_v0 }
  0x64   :  { %474 = vmatpush3.bf16.msra.mxu1 %v521_v10 }
  0x65   :  { %475 = vmatprep.subr.bf16.mxu1 %v655_v0  ;;  %490 = vmatpush3.bf16.msra.mxu0 %v527_v16 }
  0x66   :  { %491 = vmatprep.subr.bf16.mxu0 %v655_v0 }
  0x68   :  { %476 = vmatpush3.bf16.msra.mxu1 %v522_v11 }
  0x69   :  { %492 = vmatpush3.bf16.msra.mxu0 %v528_v17 }
  0x6a   :  { %493 = vmatprep.subr.bf16.mxu0 %v655_v0 }
  0x6d   :  { %494 = vmatpush3.bf16.msra.mxu0 %v529_v28 }
  0x6e   :  { %495 = vmatprep.subr.bf16.mxu0 %v655_v0 }
  0x71   :  { %496 = vmatpush3.bf16.msra.mxu0 %v530_v29 }
 0x126   :  { %v151_v19 = vpop.f32.mrb[0].mxu0 }
 0x127   :  { %v152_v20 = vadd.f32 %v409_v18, %v151_v19  ;;  %v459_v21 = vpop.f32.mrb[1].mxu0 }
 0x128   :  { %v154_v22 = vpop.f32.mrb[2].mxu0 }
 0x129   :  { %v155_v23 = vadd.f32 %v409_v18, %v154_v22  ;;  %v460_v24 = vpop.f32.mrb[3].mxu0  ;;  %v158_v25 = vmax.f32 %v152_v20, 0.0 }
 0x12b   :  { %v159_v26 = vmax.f32 %v155_v23, 0.0 }
 0x12d   :  { %v160_v27 = vpack.c.bf16 %v159_v26, %v158_v25 }
 0x12f   :  { %478 = vmatmul.mubr.bf16.vlgmr.msra.gmra.mrb[0].mxu1 %v160_v27 }
 0x202   :  { %v266_v31 = vpop.f32.mrb[0].mxu1 }
 0x203   :  { %v267_v32 = vadd.f32 %v414_v30, %v266_v31  ;;  %v479_v33 = vpop.f32.mrb[1].mxu1 }
 0x204   :  { %v269_v34 = vpop.f32.mrb[2].mxu1 }
 0x205   :  { %v270_v35 = vadd.f32 %v414_v30, %v269_v34  ;;  %v480_v36 = vpop.f32.mrb[3].mxu1  ;;  %v273_v37 = vmax.f32 %v267_v32, 0.0 }
 0x207   :  { %v274_v38 = vmax.f32 %v270_v35, 0.0 }
 0x209   :  { %v275_v39 = vpack.c.bf16 %v274_v38, %v273_v37 }
 0x20b   :  { %498 = vmatmul.mubr.bf16.vlgmr.msra.gmra.mrb[4].mxu0 %v275_v39 }
 0x2de   :  { %v381_v41 = vpop.f32.mrb[4].mxu0 }
 0x2df   :  { %v382_v42 = vadd.f32 %v423_v40, %v381_v41  ;;  %v499_v43 = vpop.f32.mrb[5].mxu0 }
 0x2e0   :  { %v384_v44 = vpop.f32.mrb[6].mxu0 }
 0x2e1   :  { %388 = vst [vmem:[#allocation10] sm:$0xff] %v382_v42  ;;  %v385_v45 = vadd.f32 %v423_v40, %v384_v44  ;;  %v500_v46 = vpop.f32.mrb[7].mxu0 }
 0x2e3   :  { %389 = vst [vmem:[#allocation10 + $0x8] sm:$0xff] %v385_v45 }
 0x2e4   :  { %630 = shalt.err (!%p627_p8)
}
 0x2e5   :  { %s631_s9 = scalar_lea.hbm %s826_s7, 256 }
 0x2e6   :  { %p632_p9 = scmp.ne.s32.totalorder %s826_s7, %s631_s9  ;;  %p635_p10 = scmp.lt.u32.totalorder %s631_s9, %s826_s7 }
 0x2e8   :  { %p637_p11 = pnand %p635_p10, %p632_p9 }
 0x2ea   :  { %640 = shalt.err (!%p637_p11)
}
 0x2eb   :  { %s658_s16 = smov 128   ;;  %s659_s0 = smov 8  }
 0x2ec   :  { %401 = dma.vmem_to_hbm [thread:$0]  %s396_s30, 256, %s826_s7, [#allocation4], %s658_s16, %s658_s16, %s659_s0  }
 0x2ed   :  { %647 = dma.done.wait [#allocation4], 256  }
 0x2ee   :  { %648 = vsyncadd [#allocation4], 4294967040 }
 0x2ef   :  { %405 = vsyncpa [#allocation3], 1 }
 0x2f0   :  { %406 = vsyncpa [#allocation6], 1 }
 0x2f1   :  { %407 = vsyncpa [#allocation9], 1 }
 0x2f2   :  { %408 = vsyncpa [#allocation4], 1 }

</bundles_post_ra>
